<compile_context>
chip_gen: v5e
topology: v5e:2x2
jax: 0.10.0
libtpu: 0.0.40
codegen_flags: <defaults>
</compile_context>

<pallas_src>
import math
import functools

import numpy as np
import jax
import jax.numpy as jnp
from jax.experimental import pallas as pl
from jax.experimental.pallas import tpu as pltpu

_LANE = 128


def _round_up(v, m):
    return ((v + m - 1) // m) * m


def _pad2d(a, rows, cols):
    pr, pc = rows - a.shape[0], cols - a.shape[1]
    if pr or pc:
        a = jnp.pad(a, ((0, pr), (0, pc)))
    return a


def _default_vmem_limit_bytes():
    """Generation-aware scoped-VMEM budget (leave headroom for the compiler)."""
    try:
        cap = int(pltpu.get_tpu_info().vmem_capacity_bytes)
    except Exception:
        cap = 128 * 1024 * 1024
    return max(16 * 1024 * 1024, min((cap * 3) // 4, 96 * 1024 * 1024))


# --------------------------------------------------------------------------
# Stage 1: support = X @ W   (computed exactly once; tiled over rows x f_out)
# --------------------------------------------------------------------------
def _project_kernel(x_ref, w_ref, s_ref, *, compute_dtype):
    x = x_ref[...].astype(compute_dtype)
    w = w_ref[...].astype(compute_dtype)
    s_ref[...] = jnp.dot(
        x, w, preferred_element_type=jnp.float32
    ).astype(s_ref.dtype)


# --------------------------------------------------------------------------
# Stage 2: out = A @ support [+ bias]
#   K-tiled reduction accumulating directly into the (VMEM-resident) f32
#   output block.  Adjacency tile is cast to the compute dtype in-kernel.
# --------------------------------------------------------------------------
def _aggregate_kernel(*refs, has_bias, resident_support, tk, compute_dtype):
    if has_bias:
        adj_ref, s_ref, b_ref, o_ref = refs
    else:
        adj_ref, s_ref, o_ref = refs
        b_ref = None

    k = pl.program_id(1)

    @pl.when(k == 0)
    def _():
        o_ref[...] = jnp.zeros_like(o_ref)

    adj_tile = adj_ref[...].astype(compute_dtype)   # VPU cast; free vs DMA

    if resident_support:
        start = pl.multiple_of(k * tk, tk)
        s_tile = s_ref[pl.ds(start, tk), :]
    else:
        s_tile = s_ref[...]

    o_ref[...] += jnp.dot(adj_tile, s_tile, preferred_element_type=jnp.float32)

    @pl.when(k == pl.num_programs(1) - 1)
    def _():
        if has_bias:
            o_ref[...] += b_ref[...]


# --------------------------------------------------------------------------
# Wrapper
# --------------------------------------------------------------------------
def graph_convolution(
    adj,
    x,
    weight,
    bias=None,
    *,
    compute_dtype=jnp.float32,
    block_rows=512,            # tm: output-row block (sweep 512 / 1024)
    block_k=512,               # tk: contraction (node) block, decoupled from tm
    support_resident_bytes=8 * 1024 * 1024,
    weight_block_bytes=8 * 1024 * 1024,
    vmem_limit_bytes=None,
):
    """Pallas GCN layer: adj @ (x @ weight) [+ bias].  Returns float32."""
    n_nodes, in_features = x.shape
    out_features = weight.shape[1]
    assert adj.shape == (n_nodes, n_nodes)
    assert block_rows % _LANE == 0 and block_k % _LANE == 0

    if vmem_limit_bytes is None:
        vmem_limit_bytes = _default_vmem_limit_bytes()

    c_itemsize = int(np.dtype(compute_dtype).itemsize)

    # ---- padded (lane-friendly) problem sizes ----
    f_in_p = _round_up(in_features, _LANE)
    f_out_p = _round_up(out_features, _LANE)       # lane-dense output slab

    if n_nodes <= max(block_rows, block_k):
        # Small graph: single tile; pad nodes to a 128-lane multiple so the
        # adjacency block gets clean unmasked vld/vst in both f32 and bf16.
        n_pad = _round_up(max(n_nodes, _LANE), _LANE)
        tm = tk = n_pad
    else:
        tm, tk = block_rows, block_k
        n_pad = _round_up(n_nodes, math.lcm(tm, tk))

    # ---- pad operands (kept f32; casts happen in-kernel on the VPU) ----
    adj_p = _pad2d(adj.astype(jnp.float32), n_pad, n_pad)
    x_p = _pad2d(x.astype(jnp.float32), n_pad, f_in_p)
    w_p = _pad2d(weight.astype(jnp.float32), f_in_p, f_out_p)

    has_bias = bias is not None
    if has_bias:
        bias_p = _pad2d(bias.reshape(1, out_features).astype(jnp.float32),
                        1, f_out_p)

    # ---- stage-1 weight tiling over out_features (v7x VMEM guard) ----
    if f_in_p * f_out_p * 4 <= weight_block_bytes:
        tf_out = f_out_p
    else:
        tf_out = _LANE
        cand = _LANE
        while cand <= f_out_p:
            if f_out_p % cand == 0 and f_in_p * cand * 4 <= weight_block_bytes:
                tf_out = cand
            cand += _LANE

    # ---- keep `support` VMEM-resident in stage 2 when it is small ----
    support_bytes = n_pad * f_out_p * c_itemsize
    resident_support = (
        2 * support_bytes <= support_resident_bytes
        and 2 * support_bytes <= vmem_limit_bytes // 4
    )

    ce1 = pl.CostEstimate(
        flops=int(2 * n_pad * f_in_p * f_out_p),
        transcendentals=0,
        bytes_accessed=int(n_pad * f_in_p * 4 + f_in_p * f_out_p * 4
                           + n_pad * f_out_p * c_itemsize),
    )
    sup_read = support_bytes if resident_support else support_bytes * (n_pad // tm)
    ce2 = pl.CostEstimate(
        flops=int(2 * n_pad * n_pad * f_out_p),
        transcendentals=0,
        bytes_accessed=int(n_pad * n_pad * 4 + sup_read + n_pad * f_out_p * 4
                           + (f_out_p * 4 if has_bias else 0)),
    )

    # ---- stage 1: support = X @ W (computed exactly once) ----
    support = pl.pallas_call(
        functools.partial(_project_kernel, compute_dtype=compute_dtype),
        out_shape=jax.ShapeDtypeStruct((n_pad, f_out_p), compute_dtype),
        grid_spec=pltpu.PrefetchScalarGridSpec(
            num_scalar_prefetch=0,
            grid=(n_pad // tm, f_out_p // tf_out),
            in_specs=[
                pl.BlockSpec((tm, f_in_p), lambda i, j: (i, 0)),
                pl.BlockSpec((f_in_p, tf_out), lambda i, j: (0, j)),
            ],
            out_specs=pl.BlockSpec((tm, tf_out), lambda i, j: (i, j)),
        ),
        compiler_params=pltpu.CompilerParams(
            dimension_semantics=("parallel", "parallel"),
            vmem_limit_bytes=vmem_limit_bytes,
        ),
        cost_estimate=ce1,
    )(x_p, w_p)

    # ---- stage 2: out = A @ support (+ bias), K-tiled accumulation ----
    if resident_support:
        # Constant block index -> fetched once, stays resident; sliced in-kernel.
        sup_spec = pl.BlockSpec((n_pad, f_out_p), lambda i, k: (0, 0))
    else:
        sup_spec = pl.BlockSpec((tk, f_out_p), lambda i, k: (k, 0))

    in_specs = [
        pl.BlockSpec((tm, tk), lambda i, k: (i, k)),   # adjacency tile (f32)
        sup_spec,                                      # projected features
    ]
    args = [adj_p, support]
    if has_bias:
        in_specs.append(pl.BlockSpec((1, f_out_p), lambda i, k: (0, 0)))
        args.append(bias_p)

    out_padded = pl.pallas_call(
        functools.partial(
            _aggregate_kernel,
            has_bias=has_bias,
            resident_support=resident_support,
            tk=tk,
            compute_dtype=compute_dtype,
        ),
        out_shape=jax.ShapeDtypeStruct((n_pad, f_out_p), jnp.float32),
        grid_spec=pltpu.PrefetchScalarGridSpec(
            num_scalar_prefetch=0,
            grid=(n_pad // tm, n_pad // tk),
            in_specs=in_specs,
            out_specs=pl.BlockSpec((tm, f_out_p), lambda i, k: (i, 0)),
        ),
        compiler_params=pltpu.CompilerParams(
            dimension_semantics=("parallel", "arbitrary"),
            vmem_limit_bytes=vmem_limit_bytes,
        ),
        cost_estimate=ce2,
    )(*args)

    return out_padded[:n_nodes, :out_features]


def init_gcn_params(key, in_features, out_features, bias=False):
    """Deterministic re-implementation of GraphConvolution.reset_parameters."""
    k_w, k_b = jax.random.split(key)
    init_range = math.sqrt(6.0 / (in_features + out_features))
    weight = jax.random.uniform(
        k_w, (in_features, out_features), jnp.float32,
        minval=-init_range, maxval=init_range)
    if bias:
        stdv = 1.0 / math.sqrt(out_features)
        b = jax.random.uniform(k_b, (out_features,), jnp.float32,
                               minval=-stdv, maxval=stdv)
    else:
        b = None
    return weight, b


if __name__ == "__main__":
    key = jax.random.PRNGKey(0)
    k_adj, k_x, k_p = jax.random.split(key, 3)

    n_nodes = 300          # deliberately NOT a multiple of 128 (tests padding)
    in_features = 64
    out_features = 32

    # Node features
    x = jax.random.normal(k_x, (n_nodes, in_features), jnp.float32)

    # Symmetric normalized adjacency (dense-equivalent of the sparse input)
    a = jax.random.uniform(k_adj, (n_nodes, n_nodes), jnp.float32)
    a = (a > 0.9).astype(jnp.float32)
    a = jnp.minimum(a + a.T + jnp.eye(n_nodes, dtype=jnp.float32), 1.0)
    deg = jnp.sum(a, axis=1)
    d_inv_sqrt = 1.0 / jnp.sqrt(deg)
    adj = a * d_inv_sqrt[:, None] * d_inv_sqrt[None, :]

    # Parameters (module default: bias=False); also grab a bias vector
    weight, _ = init_gcn_params(k_p, in_features, out_features, bias=False)
    _, bias_vec = init_gcn_params(k_p, in_features, out_features, bias=True)

    # High-precision reference
    ref = jnp.dot(
        adj,
        jnp.dot(x, weight, precision=jax.lax.Precision.HIGHEST),
        precision=jax.lax.Precision.HIGHEST,
    )
    ref_bias = ref + bias_vec[None, :]

    # 1) f32 compute path, no bias (module default), default single-tile config.
    #    (Kernel dots use default MXU precision, not HIGHEST -> ~1e-3 level.)
    out_f32 = jax.block_until_ready(graph_convolution(adj, x, weight, None))
    assert out_f32.shape == (n_nodes, out_features)
    assert jnp.allclose(out_f32, ref, atol=5e-3, rtol=5e-3)

    # 2) bf16 compute path with bias; decoupled tm/tk forces a multi-step K
    #    accumulation with the VMEM-resident `support` path.
    out_bf16 = jax.block_until_ready(graph_convolution(
        adj, x, weight, bias_vec, compute_dtype=jnp.bfloat16,
        block_rows=128, block_k=256))
    assert out_bf16.shape == (n_nodes, out_features)
    assert jnp.allclose(out_bf16, ref_bias, atol=1.5e-1, rtol=5e-2)

    # 3) Same config but force the streaming (non-resident) support path.
    out_stream = jax.block_until_ready(graph_convolution(
        adj, x, weight, bias_vec, compute_dtype=jnp.bfloat16,
        block_rows=128, block_k=256, support_resident_bytes=0))
    assert jnp.allclose(out_stream, ref_bias, atol=1.5e-1, rtol=5e-2)

    print("KERNEL_OK")
</pallas_src>

<mosaic_0001>
module attributes {stable_mosaic.version = 11 : i64} {
  func.func @_project_kernel(%arg0: i32, %arg1: i32, %arg2: memref<384x128xf32, #tpu.memory_space<vmem>>, %arg3: memref<128x128xf32, #tpu.memory_space<vmem>>, %arg4: memref<384x128xf32, #tpu.memory_space<vmem>>) attributes {dimension_semantics = [#tpu.dimension_semantics<parallel>, #tpu.dimension_semantics<parallel>], iteration_bounds = array<i64: 1, 1>, scalar_prefetch = 0 : i64, scratch_operands = 0 : i64, tpu.core_type = #tpu.core_type<tc>, window_params = [{transform_indices = @transform_0, window_bounds = array<i64: 384, 128>}, {transform_indices = @transform_1, window_bounds = array<i64: 128, 128>}, {transform_indices = @transform_2, window_bounds = array<i64: 384, 128>}]} {
    %c0 = arith.constant 0 : index
    %c0_0 = arith.constant 0 : index
    %0 = vector.load %arg2[%c0, %c0_0] : memref<384x128xf32, #tpu.memory_space<vmem>>, vector<384x128xf32>
    %c0_1 = arith.constant 0 : index
    %c0_2 = arith.constant 0 : index
    %1 = vector.load %arg3[%c0_1, %c0_2] : memref<128x128xf32, #tpu.memory_space<vmem>>, vector<128x128xf32>
    %cst = arith.constant dense<0.000000e+00> : vector<384x128xf32>
    %2 = tpu.matmul %0, %1, %cst {dimension_numbers = #tpu.dot_dimension_numbers<[1], [0], [0], [1], [0, 0, 1, 1], [], []>} : vector<384x128xf32>, vector<128x128xf32>, vector<384x128xf32> -> vector<384x128xf32>
    %c0_3 = arith.constant 0 : index
    %c0_4 = arith.constant 0 : index
    %3 = vector.load %arg4[%c0_3, %c0_4] : memref<384x128xf32, #tpu.memory_space<vmem>>, vector<384x128xf32>
    tpu.vector_store %arg4[%c0_3, %c0_4], %2 {strides = array<i32>} : memref<384x128xf32, #tpu.memory_space<vmem>>, vector<384x128xf32>,
    return
  }
  func.func @transform_0(%arg0: i32, %arg1: i32) -> (i32, i32) {
    %c0_i32 = arith.constant 0 : i32
    %c0_i32_0 = arith.constant 0 : i32
    return %arg0, %c0_i32 : i32, i32
  }
  func.func @transform_1(%arg0: i32, %arg1: i32) -> (i32, i32) {
    %c0_i32 = arith.constant 0 : i32
    %c0_i32_0 = arith.constant 0 : i32
    return %c0_i32, %arg1 : i32, i32
  }
  func.func @transform_2(%arg0: i32, %arg1: i32) -> (i32, i32) {
    %c0_i32 = arith.constant 0 : i32
    return %arg0, %arg1 : i32, i32
  }
}

</mosaic_0001>

<bundles_post_ra>
// kernel: tpu_custom_call.1
= control target key start
LH: loop header
LB: loop body
LE: loop exit
PB: predicated region body
PF: predicated region fallthrough
CT: control target
= control target key end

     0   :  { %7 = vsyncpa [#allocation3], 0  ;;  %s506_s0 = inlined_call_operand.hbm [shape: f32[384,128], index: 0, kind: input, shape index: {}]   ;;  %s507_s1 = inlined_call_operand.hbm [shape: f32[128,128], index: 1, kind: input, shape index: {}]   ;;  %s508_s2 = inlined_call_operand.hbm [shape: f32[384,128], index: 2, kind: output, shape index: {}]  }
   0x1   :  { %8 = vsyncpa [#allocation6], 0 }
   0x2   :  { %9 = vsyncpa [#allocation4], 0  ;;  %s14_s11 = sshll.u32 %s506_s0, 4  ;;  %s468_s12 = smov [#allocation2]   ;;  %s15_s11 = int_to_ptr.hbm [resolvable:$true] %s14_s11 }
   0x3   :  { %s16_s13 = sshll.u32 %s468_s12, 4  ;;  %s27_s16 = sshll.u32 %s507_s1, 4  ;;  %s17_s13 = int_to_ptr.vmem [resolvable:$true] %s16_s13  ;;  %s28_s16 = int_to_ptr.hbm [resolvable:$true] %s27_s16 }
   0x4   :  { %s469_s17 = smov 128   ;;  %s470_s18 = smov 8  }
   0x5   :  { %22 = dma.hbm_to_vmem [thread:$0]  %s15_s11, 6144, %s17_s13, [#allocation3], %s469_s17, %s469_s17, %s470_s18  }
   0x6   :  { %s471_s19 = smov [#allocation5]  }
   0x7   :  { %s29_s20 = sshll.u32 %s471_s19, 4  ;;  %s30_s20 = int_to_ptr.vmem [resolvable:$true] %s29_s20 }
   0x8   :  { %35 = dma.hbm_to_vmem [thread:$0]  %s28_s16, 2048, %s30_s20, [#allocation6], %s469_s17, %s469_s17, %s470_s18  }
   0x9   :  { %462 = dma.done.wait [#allocation3], 6144  }
   0xa   :  { %463 = vsyncadd [#allocation3], 4294961152 }
   0xb   :  { %464 = dma.done.wait [#allocation6], 2048  }
   0xc   :  { %465 = vsyncadd [#allocation6], 4294965248  ;;  %v107_v0 = vld [vmem:[#allocation5 + $0x78] sm:$0xff]  ;;  %v106_v1 = vld [vmem:[#allocation5 + $0x70] sm:$0xff]  ;;  %s472_s0 = smov [#allocation7]   ;;  %s323_s23 = sshll.u32 %s508_s2, 4  ;;  %s324_s23 = int_to_ptr.hbm [resolvable:$true] %s323_s23 }
   0xd   :  { %338 = vmatpush.msra.mxu2 %v107_v0  ;;  %339 = vmatpush.msra.mxu3 %v107_v0  ;;  %v105_v2 = vld [vmem:[#allocation5 + $0x68] sm:$0xff]  ;;  %v104_v3 = vld [vmem:[#allocation5 + $0x60] sm:$0xff]  ;;  %v103_v4 = vld [vmem:[#allocation5 + $0x58] sm:$0xff]  ;;  %s321_s1 = sshll.u32 %s472_s0, 4  ;;  %s322_s1 = int_to_ptr.vmem [resolvable:$true] %s321_s1 }
   0xe   :  { %108 = vmatpush.msra.mxu0 %v107_v0  ;;  %337 = vmatpush.msra.mxu1 %v107_v0  ;;  %v102_v5 = vld [vmem:[#allocation5 + $0x50] sm:$0xff]  ;;  %v101_v6 = vld [vmem:[#allocation5 + $0x48] sm:$0xff]  ;;  %v100_v7 = vld [vmem:[#allocation5 + $0x40] sm:$0xff] }
   0xf   :  { %341 = vmatpush.msra.mxu2 %v106_v1  ;;  %342 = vmatpush.msra.mxu3 %v106_v1  ;;  %v99_v8 = vld [vmem:[#allocation5 + $0x38] sm:$0xff]  ;;  %v98_v9 = vld [vmem:[#allocation5 + $0x30] sm:$0xff]  ;;  %v97_v10 = vld [vmem:[#allocation5 + $0x28] sm:$0xff] }
  0x10   :  { %109 = vmatpush.msra.mxu0 %v106_v1  ;;  %340 = vmatpush.msra.mxu1 %v106_v1  ;;  %v96_v11 = vld [vmem:[#allocation5 + $0x20] sm:$0xff]  ;;  %v95_v12 = vld [vmem:[#allocation5 + $0x18] sm:$0xff]  ;;  %v94_v13 = vld [vmem:[#allocation5 + $0x10] sm:$0xff] }
  0x11   :  { %344 = vmatpush.msra.mxu2 %v105_v2  ;;  %345 = vmatpush.msra.mxu3 %v105_v2  ;;  %v93_v14 = vld [vmem:[#allocation5 + $0x8] sm:$0xff]  ;;  %v92_v15 = vld [vmem:[#allocation5] sm:$0xff]  ;;  %v70_v24 = vld [vmem:[#allocation2 + $0xd0] sm:$0xff] }
  0x12   :  { %110 = vmatpush.msra.mxu0 %v105_v2  ;;  %343 = vmatpush.msra.mxu1 %v105_v2  ;;  %v68_v16 = vld [vmem:[#allocation2 + $0xc0] sm:$0xff]  ;;  %v69_v20 = vld [vmem:[#allocation2 + $0xc8] sm:$0xff]  ;;  %v82_v25 = vld [vmem:[#allocation2 + $0x130] sm:$0xff] }
  0x13   :  { %347 = vmatpush.msra.mxu2 %v104_v3  ;;  %348 = vmatpush.msra.mxu3 %v104_v3  ;;  %v80_v17 = vld [vmem:[#allocation2 + $0x120] sm:$0xff]  ;;  %v81_v21 = vld [vmem:[#allocation2 + $0x128] sm:$0xff]  ;;  %v46_v26 = vld [vmem:[#allocation2 + $0x10] sm:$0xff] }
  0x14   :  { %111 = vmatpush.msra.mxu0 %v104_v3  ;;  %346 = vmatpush.msra.mxu1 %v104_v3  ;;  %v44_v18 = vld [vmem:[#allocation2] sm:$0xff]  ;;  %v45_v22 = vld [vmem:[#allocation2 + $0x8] sm:$0xff]  ;;  %v58_v27 = vld [vmem:[#allocation2 + $0x70] sm:$0xff] }
  0x15   :  { %350 = vmatpush.msra.mxu2 %v103_v4  ;;  %351 = vmatpush.msra.mxu3 %v103_v4  ;;  %v56_v19 = vld [vmem:[#allocation2 + $0x60] sm:$0xff]  ;;  %v57_v23 = vld [vmem:[#allocation2 + $0x68] sm:$0xff]  ;;  %v71_v28 = vld [vmem:[#allocation2 + $0xd8] sm:$0xff] }
  0x16   :  { %112 = vmatpush.msra.mxu0 %v103_v4  ;;  %349 = vmatpush.msra.mxu1 %v103_v4  ;;  %v83_v29 = vld [vmem:[#allocation2 + $0x138] sm:$0xff]  ;;  %v72_v32 = vld [vmem:[#allocation2 + $0xe0] sm:$0xff]  ;;  %v73_v36 = vld [vmem:[#allocation2 + $0xe8] sm:$0xff] }
  0x17   :  { %353 = vmatpush.msra.mxu2 %v102_v5  ;;  %354 = vmatpush.msra.mxu3 %v102_v5  ;;  %v47_v30 = vld [vmem:[#allocation2 + $0x18] sm:$0xff]  ;;  %v84_v33 = vld [vmem:[#allocation2 + $0x140] sm:$0xff]  ;;  %v85_v37 = vld [vmem:[#allocation2 + $0x148] sm:$0xff] }
  0x18   :  { %113 = vmatpush.msra.mxu0 %v102_v5  ;;  %352 = vmatpush.msra.mxu1 %v102_v5  ;;  %v59_v31 = vld [vmem:[#allocation2 + $0x78] sm:$0xff]  ;;  %v48_v34 = vld [vmem:[#allocation2 + $0x20] sm:$0xff]  ;;  %v49_v38 = vld [vmem:[#allocation2 + $0x28] sm:$0xff] }
  0x19   :  { %356 = vmatpush.msra.mxu2 %v101_v6  ;;  %357 = vmatpush.msra.mxu3 %v101_v6  ;;  %v60_v35 = vld [vmem:[#allocation2 + $0x80] sm:$0xff]  ;;  %v61_v39 = vld [vmem:[#allocation2 + $0x88] sm:$0xff]  ;;  %v74_v40 = vld [vmem:[#allocation2 + $0xf0] sm:$0xff] }
  0x1a   :  { %114 = vmatpush.msra.mxu0 %v101_v6  ;;  %355 = vmatpush.msra.mxu1 %v101_v6  ;;  %v86_v41 = vld [vmem:[#allocation2 + $0x150] sm:$0xff]  ;;  %v75_v44 = vld [vmem:[#allocation2 + $0xf8] sm:$0xff]  ;;  %v76_v48 = vld [vmem:[#allocation2 + $0x100] sm:$0xff] }
  0x1b   :  { %359 = vmatpush.msra.mxu2 %v100_v7  ;;  %360 = vmatpush.msra.mxu3 %v100_v7  ;;  %v50_v42 = vld [vmem:[#allocation2 + $0x30] sm:$0xff]  ;;  %v87_v45 = vld [vmem:[#allocation2 + $0x158] sm:$0xff]  ;;  %v88_v49 = vld [vmem:[#allocation2 + $0x160] sm:$0xff] }
  0x1c   :  { %115 = vmatpush.msra.mxu0 %v100_v7  ;;  %358 = vmatpush.msra.mxu1 %v100_v7  ;;  %v62_v43 = vld [vmem:[#allocation2 + $0x90] sm:$0xff]  ;;  %v51_v46 = vld [vmem:[#allocation2 + $0x38] sm:$0xff]  ;;  %v52_v50 = vld [vmem:[#allocation2 + $0x40] sm:$0xff] }
  0x1d   :  { %362 = vmatpush.msra.mxu2 %v99_v8  ;;  %363 = vmatpush.msra.mxu3 %v99_v8  ;;  %v63_v47 = vld [vmem:[#allocation2 + $0x98] sm:$0xff]  ;;  %v64_v51 = vld [vmem:[#allocation2 + $0xa0] sm:$0xff]  ;;  %v77_v52 = vld [vmem:[#allocation2 + $0x108] sm:$0xff] }
  0x1e   :  { %116 = vmatpush.msra.mxu0 %v99_v8  ;;  %361 = vmatpush.msra.mxu1 %v99_v8  ;;  %v89_v53 = vld [vmem:[#allocation2 + $0x168] sm:$0xff]  ;;  %v78_v56 = vld [vmem:[#allocation2 + $0x110] sm:$0xff]  ;;  %v79_v60 = vld [vmem:[#allocation2 + $0x118] sm:$0xff] }
  0x1f   :  { %365 = vmatpush.msra.mxu2 %v98_v9  ;;  %366 = vmatpush.msra.mxu3 %v98_v9  ;;  %v53_v54 = vld [vmem:[#allocation2 + $0x48] sm:$0xff]  ;;  %v90_v57 = vld [vmem:[#allocation2 + $0x170] sm:$0xff]  ;;  %v91_v61 = vld [vmem:[#allocation2 + $0x178] sm:$0xff] }
  0x20   :  { %117 = vmatpush.msra.mxu0 %v98_v9  ;;  %364 = vmatpush.msra.mxu1 %v98_v9  ;;  %v65_v55 = vld [vmem:[#allocation2 + $0xa8] sm:$0xff]  ;;  %v54_v58 = vld [vmem:[#allocation2 + $0x50] sm:$0xff]  ;;  %v55_v62 = vld [vmem:[#allocation2 + $0x58] sm:$0xff] }
  0x21   :  { %368 = vmatpush.msra.mxu2 %v97_v10  ;;  %369 = vmatpush.msra.mxu3 %v97_v10  ;;  %v66_v59 = vld [vmem:[#allocation2 + $0xb0] sm:$0xff]  ;;  %v67_v63 = vld [vmem:[#allocation2 + $0xb8] sm:$0xff] }
  0x22   :  { %118 = vmatpush.msra.mxu0 %v97_v10  ;;  %367 = vmatpush.msra.mxu1 %v97_v10 }
  0x23   :  { %371 = vmatpush.msra.mxu2 %v96_v11  ;;  %372 = vmatpush.msra.mxu3 %v96_v11 }
  0x24   :  { %119 = vmatpush.msra.mxu0 %v96_v11  ;;  %370 = vmatpush.msra.mxu1 %v96_v11 }
  0x25   :  { %374 = vmatpush.msra.mxu2 %v95_v12  ;;  %375 = vmatpush.msra.mxu3 %v95_v12 }
  0x26   :  { %120 = vmatpush.msra.mxu0 %v95_v12  ;;  %373 = vmatpush.msra.mxu1 %v95_v12 }
  0x27   :  { %377 = vmatpush.msra.mxu2 %v94_v13  ;;  %378 = vmatpush.msra.mxu3 %v94_v13 }
  0x28   :  { %121 = vmatpush.msra.mxu0 %v94_v13  ;;  %376 = vmatpush.msra.mxu1 %v94_v13 }
  0x29   :  { %380 = vmatpush.msra.mxu2 %v93_v14  ;;  %381 = vmatpush.msra.mxu3 %v93_v14 }
  0x2a   :  { %122 = vmatpush.msra.mxu0 %v93_v14  ;;  %379 = vmatpush.msra.mxu1 %v93_v14 }
  0x2b   :  { %383 = vmatpush.msra.mxu2 %v92_v15  ;;  %384 = vmatpush.msra.mxu3 %v92_v15 }
  0x2c   :  { %196 = vmatmul.f32.vlgmr.msra.gmra.mxu2 %v68_v16  ;;  %232 = vmatmul.f32.vlgmr.msra.gmra.mxu3 %v80_v17 }
  0x2d   :  { %123 = vmatpush.msra.mxu0 %v92_v15  ;;  %382 = vmatpush.msra.mxu1 %v92_v15 }
  0x2e   :  { %124 = vmatmul.f32.vlgmr.msra.gmra.mxu0 %v44_v18  ;;  %160 = vmatmul.f32.vlgmr.msra.gmra.mxu1 %v56_v19 }
  0x34   :  { %199 = vmatmul.f32.gmra.mxu2 %v69_v20  ;;  %235 = vmatmul.f32.gmra.mxu3 %v81_v21 }
  0x36   :  { %127 = vmatmul.f32.gmra.mxu0 %v45_v22  ;;  %163 = vmatmul.f32.gmra.mxu1 %v57_v23 }
  0x3c   :  { %202 = vmatmul.f32.gmra.mxu2 %v70_v24  ;;  %238 = vmatmul.f32.gmra.mxu3 %v82_v25 }
  0x3e   :  { %130 = vmatmul.f32.gmra.mxu0 %v46_v26  ;;  %166 = vmatmul.f32.gmra.mxu1 %v58_v27 }
  0x44   :  { %205 = vmatmul.f32.gmra.mxu2 %v71_v28  ;;  %241 = vmatmul.f32.gmra.mxu3 %v83_v29 }
  0x46   :  { %133 = vmatmul.f32.gmra.mxu0 %v47_v30  ;;  %169 = vmatmul.f32.gmra.mxu1 %v59_v31 }
  0x4c   :  { %208 = vmatmul.f32.gmra.mxu2 %v72_v32  ;;  %244 = vmatmul.f32.gmra.mxu3 %v84_v33 }
  0x4e   :  { %136 = vmatmul.f32.gmra.mxu0 %v48_v34  ;;  %172 = vmatmul.f32.gmra.mxu1 %v60_v35 }
  0x54   :  { %211 = vmatmul.f32.gmra.mxu2 %v73_v36  ;;  %247 = vmatmul.f32.gmra.mxu3 %v85_v37 }
  0x56   :  { %139 = vmatmul.f32.gmra.mxu0 %v49_v38  ;;  %175 = vmatmul.f32.gmra.mxu1 %v61_v39 }
  0x5c   :  { %214 = vmatmul.f32.gmra.mxu2 %v74_v40  ;;  %250 = vmatmul.f32.gmra.mxu3 %v86_v41 }
  0x5e   :  { %142 = vmatmul.f32.gmra.mxu0 %v50_v42  ;;  %178 = vmatmul.f32.gmra.mxu1 %v62_v43 }
  0x64   :  { %217 = vmatmul.f32.gmra.mxu2 %v75_v44  ;;  %253 = vmatmul.f32.gmra.mxu3 %v87_v45 }
  0x66   :  { %145 = vmatmul.f32.gmra.mxu0 %v51_v46  ;;  %181 = vmatmul.f32.gmra.mxu1 %v63_v47 }
  0x6c   :  { %220 = vmatmul.f32.gmra.mxu2 %v76_v48  ;;  %256 = vmatmul.f32.gmra.mxu3 %v88_v49 }
  0x6e   :  { %148 = vmatmul.f32.gmra.mxu0 %v52_v50  ;;  %184 = vmatmul.f32.gmra.mxu1 %v64_v51 }
  0x74   :  { %223 = vmatmul.f32.gmra.mxu2 %v77_v52  ;;  %259 = vmatmul.f32.gmra.mxu3 %v89_v53 }
  0x76   :  { %151 = vmatmul.f32.gmra.mxu0 %v53_v54  ;;  %187 = vmatmul.f32.gmra.mxu1 %v65_v55 }
  0x7c   :  { %226 = vmatmul.f32.gmra.mxu2 %v78_v56  ;;  %262 = vmatmul.f32.gmra.mxu3 %v90_v57 }
  0x7e   :  { %154 = vmatmul.f32.gmra.mxu0 %v54_v58  ;;  %190 = vmatmul.f32.gmra.mxu1 %v66_v59 }
  0x84   :  { %229 = vmatmul.f32.gmra.mxu2 %v79_v60  ;;  %265 = vmatmul.f32.gmra.mxu3 %v91_v61 }
  0x86   :  { %157 = vmatmul.f32.gmra.mxu0 %v55_v62  ;;  %193 = vmatmul.f32.gmra.mxu1 %v67_v63 }
  0xab   :  { %v125_v0 = vpop.f32.mrf.mxu0  ;;  %v161_v1 = vpop.f32.mrf.mxu1 }
  0xac   :  { %269 = vst [vmem:[#allocation7] sm:$0xff] %v125_v0 }
  0xad   :  { %281 = vst [vmem:[#allocation7 + $0x60] sm:$0xff] %v161_v1 }
  0xaf   :  { %v197_v2 = vpop.f32.mrf.mxu2  ;;  %v233_v3 = vpop.f32.mrf.mxu3 }
  0xb0   :  { %293 = vst [vmem:[#allocation7 + $0xc0] sm:$0xff] %v197_v2 }
  0xb1   :  { %305 = vst [vmem:[#allocation7 + $0x120] sm:$0xff] %v233_v3 }
  0xb3   :  { %v128_v4 = vpop.f32.mrf.mxu0  ;;  %v164_v5 = vpop.f32.mrf.mxu1 }
  0xb4   :  { %270 = vst [vmem:[#allocation7 + $0x8] sm:$0xff] %v128_v4 }
  0xb5   :  { %282 = vst [vmem:[#allocation7 + $0x68] sm:$0xff] %v164_v5 }
  0xb7   :  { %v200_v6 = vpop.f32.mrf.mxu2  ;;  %v236_v7 = vpop.f32.mrf.mxu3 }
  0xb8   :  { %294 = vst [vmem:[#allocation7 + $0xc8] sm:$0xff] %v200_v6 }
  0xb9   :  { %306 = vst [vmem:[#allocation7 + $0x128] sm:$0xff] %v236_v7 }
  0xbb   :  { %v131_v8 = vpop.f32.mrf.mxu0  ;;  %v167_v9 = vpop.f32.mrf.mxu1 }
  0xbc   :  { %271 = vst [vmem:[#allocation7 + $0x10] sm:$0xff] %v131_v8 }
  0xbd   :  { %283 = vst [vmem:[#allocation7 + $0x70] sm:$0xff] %v167_v9 }
  0xbf   :  { %v203_v10 = vpop.f32.mrf.mxu2  ;;  %v239_v11 = vpop.f32.mrf.mxu3 }
  0xc0   :  { %295 = vst [vmem:[#allocation7 + $0xd0] sm:$0xff] %v203_v10 }
  0xc1   :  { %307 = vst [vmem:[#allocation7 + $0x130] sm:$0xff] %v239_v11 }
  0xc3   :  { %v134_v12 = vpop.f32.mrf.mxu0  ;;  %v170_v13 = vpop.f32.mrf.mxu1 }
  0xc4   :  { %272 = vst [vmem:[#allocation7 + $0x18] sm:$0xff] %v134_v12 }
  0xc5   :  { %284 = vst [vmem:[#allocation7 + $0x78] sm:$0xff] %v170_v13 }
  0xc7   :  { %v206_v14 = vpop.f32.mrf.mxu2  ;;  %v242_v15 = vpop.f32.mrf.mxu3 }
  0xc8   :  { %296 = vst [vmem:[#allocation7 + $0xd8] sm:$0xff] %v206_v14 }
  0xc9   :  { %308 = vst [vmem:[#allocation7 + $0x138] sm:$0xff] %v242_v15 }
  0xcb   :  { %v137_v16 = vpop.f32.mrf.mxu0  ;;  %v173_v17 = vpop.f32.mrf.mxu1 }
  0xcc   :  { %273 = vst [vmem:[#allocation7 + $0x20] sm:$0xff] %v137_v16 }
  0xcd   :  { %285 = vst [vmem:[#allocation7 + $0x80] sm:$0xff] %v173_v17 }
  0xcf   :  { %v209_v18 = vpop.f32.mrf.mxu2  ;;  %v245_v19 = vpop.f32.mrf.mxu3 }
  0xd0   :  { %297 = vst [vmem:[#allocation7 + $0xe0] sm:$0xff] %v209_v18 }
  0xd1   :  { %309 = vst [vmem:[#allocation7 + $0x140] sm:$0xff] %v245_v19 }
  0xd3   :  { %v140_v20 = vpop.f32.mrf.mxu0  ;;  %v176_v21 = vpop.f32.mrf.mxu1 }
  0xd4   :  { %274 = vst [vmem:[#allocation7 + $0x28] sm:$0xff] %v140_v20 }
  0xd5   :  { %286 = vst [vmem:[#allocation7 + $0x88] sm:$0xff] %v176_v21 }
  0xd7   :  { %v212_v22 = vpop.f32.mrf.mxu2  ;;  %v248_v23 = vpop.f32.mrf.mxu3 }
  0xd8   :  { %298 = vst [vmem:[#allocation7 + $0xe8] sm:$0xff] %v212_v22 }
  0xd9   :  { %310 = vst [vmem:[#allocation7 + $0x148] sm:$0xff] %v248_v23 }
  0xdb   :  { %v143_v24 = vpop.f32.mrf.mxu0  ;;  %v179_v25 = vpop.f32.mrf.mxu1 }
  0xdc   :  { %275 = vst [vmem:[#allocation7 + $0x30] sm:$0xff] %v143_v24 }
  0xdd   :  { %287 = vst [vmem:[#allocation7 + $0x90] sm:$0xff] %v179_v25 }
  0xdf   :  { %v215_v26 = vpop.f32.mrf.mxu2  ;;  %v251_v27 = vpop.f32.mrf.mxu3 }
  0xe0   :  { %299 = vst [vmem:[#allocation7 + $0xf0] sm:$0xff] %v215_v26 }
  0xe1   :  { %311 = vst [vmem:[#allocation7 + $0x150] sm:$0xff] %v251_v27 }
  0xe3   :  { %v146_v28 = vpop.f32.mrf.mxu0  ;;  %v182_v29 = vpop.f32.mrf.mxu1 }
  0xe4   :  { %276 = vst [vmem:[#allocation7 + $0x38] sm:$0xff] %v146_v28 }
  0xe5   :  { %288 = vst [vmem:[#allocation7 + $0x98] sm:$0xff] %v182_v29 }
  0xe7   :  { %v218_v30 = vpop.f32.mrf.mxu2  ;;  %v254_v31 = vpop.f32.mrf.mxu3 }
  0xe8   :  { %300 = vst [vmem:[#allocation7 + $0xf8] sm:$0xff] %v218_v30 }
  0xe9   :  { %312 = vst [vmem:[#allocation7 + $0x158] sm:$0xff] %v254_v31 }
  0xeb   :  { %v149_v32 = vpop.f32.mrf.mxu0  ;;  %v185_v33 = vpop.f32.mrf.mxu1 }
  0xec   :  { %277 = vst [vmem:[#allocation7 + $0x40] sm:$0xff] %v149_v32 }
  0xed   :  { %289 = vst [vmem:[#allocation7 + $0xa0] sm:$0xff] %v185_v33 }
  0xef   :  { %v221_v34 = vpop.f32.mrf.mxu2  ;;  %v257_v35 = vpop.f32.mrf.mxu3 }
  0xf0   :  { %301 = vst [vmem:[#allocation7 + $0x100] sm:$0xff] %v221_v34 }
  0xf1   :  { %313 = vst [vmem:[#allocation7 + $0x160] sm:$0xff] %v257_v35 }
  0xf3   :  { %v152_v36 = vpop.f32.mrf.mxu0  ;;  %v188_v37 = vpop.f32.mrf.mxu1 }
  0xf4   :  { %278 = vst [vmem:[#allocation7 + $0x48] sm:$0xff] %v152_v36 }
  0xf5   :  { %290 = vst [vmem:[#allocation7 + $0xa8] sm:$0xff] %v188_v37 }
  0xf7   :  { %v224_v38 = vpop.f32.mrf.mxu2  ;;  %v260_v39 = vpop.f32.mrf.mxu3 }
  0xf8   :  { %302 = vst [vmem:[#allocation7 + $0x108] sm:$0xff] %v224_v38 }
  0xf9   :  { %314 = vst [vmem:[#allocation7 + $0x168] sm:$0xff] %v260_v39 }
  0xfb   :  { %v155_v40 = vpop.f32.mrf.mxu0  ;;  %v191_v41 = vpop.f32.mrf.mxu1 }
  0xfc   :  { %279 = vst [vmem:[#allocation7 + $0x50] sm:$0xff] %v155_v40 }
  0xfd   :  { %291 = vst [vmem:[#allocation7 + $0xb0] sm:$0xff] %v191_v41 }
  0xff   :  { %v227_v42 = vpop.f32.mrf.mxu2  ;;  %v263_v43 = vpop.f32.mrf.mxu3 }
 0x100   :  { %303 = vst [vmem:[#allocation7 + $0x110] sm:$0xff] %v227_v42 }
 0x101   :  { %315 = vst [vmem:[#allocation7 + $0x170] sm:$0xff] %v263_v43 }
 0x103   :  { %v158_v44 = vpop.f32.mrf.mxu0  ;;  %v194_v45 = vpop.f32.mrf.mxu1 }
 0x104   :  { %280 = vst [vmem:[#allocation7 + $0x58] sm:$0xff] %v158_v44 }
 0x105   :  { %292 = vst [vmem:[#allocation7 + $0xb8] sm:$0xff] %v194_v45 }
 0x107   :  { %v230_v46 = vpop.f32.mrf.mxu2  ;;  %v266_v47 = vpop.f32.mrf.mxu3 }
 0x108   :  { %304 = vst [vmem:[#allocation7 + $0x118] sm:$0xff] %v230_v46 }
 0x109   :  { %316 = vst [vmem:[#allocation7 + $0x178] sm:$0xff] %v266_v47 }
 0x10a   :  { %329 = dma.vmem_to_hbm [thread:$0]  %s322_s1, 6144, %s324_s23, [#allocation4], %s469_s17, %s469_s17, %s470_s18  }
 0x10b   :  { %466 = dma.done.wait [#allocation4], 6144  }
 0x10c   :  { %467 = vsyncadd [#allocation4], 4294961152 }
 0x10d   :  { %334 = vsyncpa [#allocation3], 1 }
 0x10e   :  { %335 = vsyncpa [#allocation6], 1 }
 0x10f   :  { %336 = vsyncpa [#allocation4], 1 }

</bundles_post_ra>
